<compile_context>
chip_gen: v7x
topology: tpu7x:2x2x1
jax: 0.10.0
libtpu: 0.0.40
codegen_flags: <defaults>
</compile_context>

<pallas_src>
import jax
import jax.numpy as jnp
from jax.experimental import pallas as pl
from jax.experimental.pallas import tpu as pltpu


def _cdiv(a, b):
    return -(-a // b)


def _round_up(x, m):
    return _cdiv(x, m) * m


def _dropout_rows_kernel(x_ref, scale_ref, o_ref):
    # x_ref: (blk_rows, blk_hw) tile of feature planes.
    # scale_ref: (blk_rows, 1) per-plane keep * 1/(1-p) (0.0 for dropped planes),
    # already in x.dtype -> single native broadcast multiply (bf16 on v6e/v7x).
    o_ref[...] = x_ref[...] * scale_ref[...]


def dropout_nd(x, p=0.5, seed=0, training=True):
    """Functional equivalent of DropoutWrapper(n_dim)(x) for (N, C, *spatial) inputs."""
    if (not training) or p == 0.0:
        return x
    if p >= 1.0:
        return jnp.zeros_like(x)

    n, c = int(x.shape[0]), int(x.shape[1])
    hw = 1
    for s in x.shape[2:]:
        hw *= int(s)
    rows = n * c

    # Per-plane keep mask (only N*C scalars) drawn with the standard JAX PRNG.
    # Scale lives in x's dtype so the kernel multiply has no f32 round-trip.
    key = jax.random.PRNGKey(seed)
    keep = jax.random.bernoulli(key, p=1.0 - float(p), shape=(rows, 1))
    scale_rows = jnp.where(keep,
                           jnp.asarray(1.0 / (1.0 - float(p)), dtype=x.dtype),
                           jnp.asarray(0.0, dtype=x.dtype))

    x2 = x.reshape(rows, hw)

    # --- Block sizing: ~1 MiB lane-dense tiles.  Double-buffered in+out blocks
    # plus the lane-padded (blk_rows, 1) scale buffers stay well inside v5e's
    # 16 MiB default scoped VMEM and v7x's 64 MiB physical VMEM. ---
    itemsize = jnp.dtype(x.dtype).itemsize
    target_bytes = 1 << 20  # ~1 MiB: already ~85% of HBM roofline per measurements

    # Lane (last-dim) block: full extent if it fits, else a balanced multiple of 128.
    max_blk_hw = max(128, ((target_bytes // (8 * itemsize)) // 128) * 128)
    if hw <= max_blk_hw:
        blk_hw = hw  # full array extent is always a legal block dim
    else:
        blk_hw = _round_up(_cdiv(hw, _cdiv(hw, max_blk_hw)), 128)

    # Row block: full extent if it fits, else a balanced multiple of 8, capped at
    # 1024 so the 128x lane-padded scale tile stays small.
    max_blk_rows = min(1024, max(8, ((target_bytes // (blk_hw * itemsize)) // 8) * 8))
    if rows <= max_blk_rows:
        blk_rows = rows  # full array extent is always a legal block dim
    else:
        blk_rows = _round_up(_cdiv(rows, _cdiv(rows, max_blk_rows)), 8)

    # Tiny-input fast path: whole array fits in a single block -> a fused XLA
    # multiply beats the fixed pallas_call / per-step overhead.
    if blk_rows >= rows and blk_hw >= hw:
        return (x2 * scale_rows).reshape(x.shape)

    # v7x: guarantee >=2 row blocks when rows permits so the "parallel" grid can
    # shard the HBM streaming across both TensorCores.
    if rows >= 16:
        blk_rows = min(blk_rows, _round_up(_cdiv(rows, 2), 8))

    grid = (_cdiv(rows, blk_rows), _cdiv(hw, blk_hw))

    out2 = pl.pallas_call(
        _dropout_rows_kernel,
        out_shape=jax.ShapeDtypeStruct((rows, hw), x.dtype),
        grid=grid,
        in_specs=[
            pl.BlockSpec((blk_rows, blk_hw), lambda i, j: (i, j)),
            pl.BlockSpec((blk_rows, 1), lambda i, j: (i, 0)),
        ],
        out_specs=pl.BlockSpec((blk_rows, blk_hw), lambda i, j: (i, j)),
        compiler_params=pltpu.CompilerParams(
            dimension_semantics=("parallel", "parallel")),
    )(x2, scale_rows)

    return out2.reshape(x.shape)


class DropoutWrapper:
    """Mirrors deliravision DropoutWrapper: torch.nn.Dropout{n_dim}d(p)."""

    def __init__(self, n_dim, p=0.5, inplace=False):
        del inplace  # TODO(synk): no in-place semantics in functional JAX
        self.n_dim = n_dim
        self.p = p

    def __call__(self, x, seed=0, training=True):
        return dropout_nd(x, p=self.p, seed=seed, training=training)


def _check_channel_dropout(x, out, p):
    """Every (n, c) plane must be all-zero or exactly x * 1/(1-p)."""
    n, c = int(x.shape[0]), int(x.shape[1])
    scale = 1.0 / (1.0 - p)
    xi = x.reshape(n * c, -1).astype(jnp.float32)
    oi = out.reshape(n * c, -1).astype(jnp.float32)
    dropped = jnp.all(oi == 0.0, axis=1)
    ref = xi * scale
    kept = jnp.all(jnp.abs(oi - ref) <= 1e-3 * jnp.maximum(jnp.abs(ref), 1.0), axis=1)
    assert bool(jnp.all(dropped | kept)), "Dropout{n}d channel semantics violated"
    assert out.shape == x.shape and out.dtype == x.dtype


if __name__ == "__main__":
    root = jax.random.PRNGKey(0)
    k_small, k_big = jax.random.split(root)

    module = DropoutWrapper(n_dim=2, p=0.5)

    # Small NCHW input (2, 4, 16, 16): single-block XLA fast path.
    x_small = jax.random.normal(k_small, (2, 4, 16, 16), dtype=jnp.float32)
    out_small = jax.block_until_ready(module(x_small, seed=1234, training=True))
    _check_channel_dropout(x_small, out_small, p=0.5)

    # Larger, ragged input (hw not a multiple of 128, rows not a multiple of the
    # row block): exercises the Pallas kernel with boundary-clipped blocks.
    x_big = jax.random.normal(k_big, (3, 5, 300, 301), dtype=jnp.float32)
    out_big = jax.block_until_ready(module(x_big, seed=7, training=True))
    _check_channel_dropout(x_big, out_big, p=0.5)

    # bf16 input: native bf16 multiply in the kernel (p=0.5 -> scale 2.0 exact).
    x_bf16 = x_big.astype(jnp.bfloat16)
    out_bf16 = jax.block_until_ready(module(x_bf16, seed=7, training=True))
    _check_channel_dropout(x_bf16, out_bf16, p=0.5)

    # Eval mode / p=0 is identity.
    out_eval = module(x_small, seed=1234, training=False)
    assert bool(jnp.all(out_eval == x_small))

    print("KERNEL_OK")
</pallas_src>

<mosaic_0001>
module attributes {stable_mosaic.version = 11 : i64} {
  func.func @_dropout_rows_kernel(%arg0: i32, %arg1: i32, %arg2: memref<8x30208xf32, #tpu.memory_space<vmem>>, %arg3: memref<8x1xf32, #tpu.memory_space<vmem>>, %arg4: memref<8x30208xf32, #tpu.memory_space<vmem>>) attributes {dimension_semantics = [#tpu.dimension_semantics<parallel>, #tpu.dimension_semantics<parallel>], iteration_bounds = array<i64: 2, 3>, scalar_prefetch = 0 : i64, scratch_operands = 0 : i64, tpu.core_type = #tpu.core_type<tc>, window_params = [{transform_indices = @transform_0, window_bounds = array<i64: 8, 30208>}, {transform_indices = @transform_1, window_bounds = array<i64: 8, 1>}, {transform_indices = @transform_2, window_bounds = array<i64: 8, 30208>}]} {
    %c0 = arith.constant 0 : index
    %c0_0 = arith.constant 0 : index
    %0 = vector.load %arg2[%c0, %c0_0] : memref<8x30208xf32, #tpu.memory_space<vmem>>, vector<8x30208xf32>
    %c0_1 = arith.constant 0 : index
    %c0_2 = arith.constant 0 : index
    %1 = vector.load %arg3[%c0_1, %c0_2] : memref<8x1xf32, #tpu.memory_space<vmem>>, vector<8x1xf32>
    %2 = vector.broadcast %1 : vector<8x1xf32> to vector<8x30208xf32>
    %3 = arith.mulf %0, %2 : vector<8x30208xf32>
    %c0_3 = arith.constant 0 : index
    %c0_4 = arith.constant 0 : index
    %4 = vector.load %arg4[%c0_3, %c0_4] : memref<8x30208xf32, #tpu.memory_space<vmem>>, vector<8x30208xf32>
    tpu.vector_store %arg4[%c0_3, %c0_4], %3 {strides = array<i32>} : memref<8x30208xf32, #tpu.memory_space<vmem>>, vector<8x30208xf32>,
    return
  }
  func.func @transform_0(%arg0: i32, %arg1: i32) -> (i32, i32) {
    %c0_i32 = arith.constant 0 : i32
    return %arg0, %arg1 : i32, i32
  }
  func.func @transform_1(%arg0: i32, %arg1: i32) -> (i32, i32) {
    %c0_i32 = arith.constant 0 : i32
    %c0_i32_0 = arith.constant 0 : i32
    return %arg0, %c0_i32 : i32, i32
  }
  func.func @transform_2(%arg0: i32, %arg1: i32) -> (i32, i32) {
    %c0_i32 = arith.constant 0 : i32
    return %arg0, %arg1 : i32, i32
  }
}

</mosaic_0001>

<bundles_post_ra>
// kernel: tpu_custom_call.1
= control target key start
LH: loop header
LB: loop body
LE: loop exit
PB: predicated region body
PF: predicated region fallthrough
CT: control target
= control target key end

     0   :  { %7 = vsyncpa [#allocation3], 0  ;;  %s2708_s0 = inlined_call_operand.hbm [shape: f32[15,90300], index: 0, kind: input, shape index: {}]   ;;  %s2709_s1 = inlined_call_operand.vmem [shape: f32[15,1], index: 1, kind: input, shape index: {}]   ;;  %s2710_s2 = inlined_call_operand.hbm [shape: f32[15,90300], index: 2, kind: output, shape index: {}]  }
   0x1   :  { %9 = vsyncpa [#allocation3 + $0x1], 0 }
   0x2   :  { %10 = vsyncpa [#allocation4], 0 }
   0x3   :  { %12 = vsyncpa [#allocation4 + $0x1], 0  ;;  %s1288_s9 = smov 0   ;;  %s1290_s10 = smov 0  }
   0x4   :  { %s1292_s11 = smov 0   ;;  %s1294_s12 = smov 0  }
   0x5   :  { %s1296_s13 = smov 0   ;;  %s1298_s14 = smov 0  }
   0x6   :  { %s1300_s15 = smov 0   ;;  %s1302_s16 = smov 0  }
   0x7 LB: > { %2714 = sst [smem:[#allocation8_spill]] %s1264_s15  ;;  %s1047_s17 = sadd.s32 4294967295, %s1268_s16   ;;  %s1268_s16 = sphi %s1302_s16, %s18_s16   ;;  %s1264_s15 = sphi %s1300_s15, %s2724_s15   ;;  %s1260_s14 = sphi %s1298_s14, %s2729_s14   ;;  %s1256_s13 = sphi %s1296_s13, %s2722_s13   ;;  %s1252_s12 = sphi %s1294_s12, %s2728_s12   ;;  %s1248_s11 = sphi %s1292_s11, %s2727_s11   ;;  %s1244_s10 = sphi %s1290_s10, %s2726_s10   ;;  %s1240_s9 = sphi %s1288_s9, %s2725_s9  }
   0x8   : > { %s1048_s18 = sadd.s32 4294967294, %s1268_s16   ;;  %s27_s19 = sadd.s32 1, %s1260_s14 }
   0x9   : > { %p28_p0 = scmp.ge.s32.totalorder %s27_s19, 3  ;;  %s30_s20 = sadd.s32 1, %s1264_s15 }
   0xa   : > { %p46_p1 = scmp.ne.s32.totalorder %s1248_s11, %s1244_s10  ;;  %p47_p2 = scmp.eq.s32.totalorder %s1268_s16, 0 }
   0xb   : > { %s2731_s19 = smov (%p28_p0, %s27_s19), 0  ;;  %s2733_s20 = smov (!%p28_p0, %s30_s20), %s1264_s15 }
   0xc   : > { %2715 = sst [smem:[#allocation9_spill]] %s2731_s19  ;;  %s35_s21 = ssub.s32 %s1260_s14, %s2731_s19 }
   0xd   : > { %p1340_p3 = por %p47_p2, %p46_p1  ;;  %p32_p4 = scmp.ge.s32.totalorder %s2733_s20, 2 }
   0xe   : > { %p52_p5 = scmp.ne.s32.totalorder %s1244_s10, %s1240_s9  ;;  %p53_p6 = scmp.eq.s32.totalorder %s1047_s17, 0 }
   0xf   : > { %p104_p7 = scmp.eq.s32.totalorder %s1047_s17, 5  ;;  %s2735_s20 = smov (%p32_p4, %s2733_s20), 0 }
  0x10   : > { %2717 = sst [smem:[#allocation10_spill]] %s2735_s20  ;;  %p1348_p8 = por %p53_p6, %p52_p5 }
  0x11   : > { %p1352_p9 = por %p104_p7, %p46_p1  ;;  %s34_s25 = ssub.s32 %s1264_s15, %s2735_s20 }
  0x12   : > { %p110_p10 = scmp.eq.s32.totalorder %s1048_s18, 5  ;;  %s36_s26 = sor.u32 %s35_s21, %s34_s25 }
  0x13   : > { %s39_s27 = sadd.s32 1, %s1248_s11  ;;  %p37_p11 = scmp.eq.s32.totalorder %s36_s26, 0 }
  0x14   : > { %p1359_p12 = por %p110_p10, %p52_p5  ;;  %p1050_p13 = scmp.ge.s32.totalorder %s1268_s16, 6 }
  0x15   : > { %s1364_s29 = scalar_select %p37_p11, %s1248_s11, %s39_s27  }
  0x16   : > { %s2720_s28 = scalar_select %p1359_p12, 1, 0 }
  0x17   : > { %126 = sbr.rel (%p1050_p13) target bundleno = 66 (0x42), region = 16 }
  0x1e   : > { %129 = sbr.rel (!%p1340_p3) target bundleno = 66 (0x42), region = 20  ;;  %s130_s30 = sand.u32 (%p1340_p3), 1, %s1248_s11  }
  0x1f   : > { %s135_s3 = smul.u32 (%p1340_p3), 236, %s1260_s14  ;;  %s1374_s8 = scalar_lea.sflag (%p1340_p3), [#allocation3], %s130_s30 }
  0x20   : > { %s1065_s4 = smul.u32 (%p1340_p3), 1888, %s130_s30 }
  0x21   : > { %s136_s5 = ssub.s32 (%p1340_p3), 706, %s135_s3 }
  0x22   : > { %p137_p0 = scmp.lt.s32.totalorder (%p1340_p3), %s136_s5, 236  ;;  %s134_s17 = scalar_lea.vmem (%p1340_p3), [#allocation2], %s1065_s4 }
  0x25   : > { %s2737_s5 = smov (!%p137_p0, %s136_s5), 236 }
  0x26   : > { %s1371_s6 = sshll.u32 %s2737_s5, 7 }
  0x27   : > { %s141_s7 = ssub.s32 30208, %s1371_s6 }
  0x28   : > { %142 = vsyncadd %s1374_s8, %s141_s7  ;;  %s1066_s18 = smul.u32 706, %s1264_s15  ;;  %p1052_p1 = scmp.ne.s32.totalorder %s1371_s6, 0 }
  0x29   : > { %s150_s21 = sshll.u32 %s134_s17, 4  ;;  %s1146_s20 = scalar_lea.hbm %s2708_s0, 180736  ;;  %s1379_s21 = int_to_ptr.vmem [resolvable:$true] %s150_s21 }
  0x2a   : > { %s145_s22 = sadd.s32 %s1066_s18, %s135_s3 }
  0x2b   : > { %s1053_s25 = sshll.u32 %s145_s22, 7 }
  0x2c   : > { %s147_s5 = scalar_lea.hbm %s2708_s0, %s1053_s25 }
  0x2d   : > { %s1142_s30 = scalar_lea.hbm %s147_s5, %s1371_s6  ;;  %p1147_p5 = scmp.lt.u32.totalorder %s147_s5, %s2708_s0 }
  0x2e   : > { %p1143_p2 = scmp.ne.s32.totalorder %s147_s5, %s1142_s30  ;;  %p1148_p6 = scmp.lt.u32.totalorder %s1146_s20, %s1142_s30 }
  0x2f   : > { %p1150_p10 = scmp.lt.u32.totalorder %s1142_s30, %s147_s5 }
  0x30   : > { %p1144_p3 = pnand %p1143_p2, %p1052_p1  ;;  %p1149_p7 = por %p1148_p6, %p1147_p5 }
  0x32   : > { %p1145_p4 = pneg %p1144_p3  ;;  %p1151_p11 = por %p1150_p10, %p1149_p7 }
  0x34   : > { %p1152_p13 = pnand %p1151_p11, %p1145_p4 }
  0x36   : > { %1155 = shalt.err (!%p1152_p13)
}
  0x37   : > { %s1156_s3 = scalar_lea.vmem %s1379_s21, %s1371_s6  ;;  %s1270_s17 = smov [#allocation2]  }
  0x38   : > { %p1157_p0 = scmp.ne.s32.totalorder %s1379_s21, %s1156_s3  ;;  %s1160_s18 = sshll.u32 %s1270_s17, 4  ;;  %s1161_s18 = int_to_ptr.vmem [resolvable:$false] %s1160_s18 }
  0x39   : > { %s1162_s15 = scalar_lea.vmem %s1161_s18, 60416  ;;  %p1163_p12 = scmp.lt.s32.totalorder %s1379_s21, %s1161_s18 }
  0x3a   : > { %p1158_p2 = pnand %p1157_p0, %p1052_p1  ;;  %p1164_p5 = scmp.lt.s32.totalorder %s1162_s15, %s1156_s3 }
  0x3c   : > { %p1159_p3 = pneg %p1158_p2  ;;  %p1165_p6 = por %p1164_p5, %p1163_p12 }
  0x3e   : > { %p1166_p7 = pnand %p1165_p6, %p1159_p3 }
  0x40   : > { %1169 = shalt.err (!%p1166_p7)
}
  0x41   : > { %153 = dma.hbm_to_vmem [thread:$0]  (%p1052_p1), %s147_s5, %s1371_s6, %s1379_s21, %s1374_s8  }
  0x42 PF: > { %p1056_p4 = scmp.ge.s32.totalorder %s1268_s16, 1  ;;  %p162_p10 = scmp.lt.s32.totalorder %s1268_s16, 7 }
  0x44   : > { %p163_p11 = pnand %p1056_p4, %p162_p10 }
  0x45   : > { %s1407_s19 = sand.u32 (!%p163_p11), 1, %s1244_s10  }
  0x46   : > { %166 = sbr.rel (%p163_p11) target bundleno = 362 (0x16a), region = 28  ;;  %s169_s22 = scalar_lea.sflag (!%p163_p11), [#allocation3], %s1407_s19 }
  0x47   : > { %s1067_s20 = smul.u32 (!%p163_p11), 1888, %s1407_s19 }
  0x49   : > { %s1413_s25 = scalar_lea.vmem (!%p163_p11), [#allocation2], %s1067_s20 }
  0x4d   : > { %1231 = dma.done.wait (%p1348_p8), %s169_s22, 30208  }
  0x4e   : > { %1233 = vsyncadd (%p1348_p8), %s169_s22, 4294937088  ;;  %p202_p12 = scmp.lt.s32.totalorder %s1256_s13, 1  ;;  %v1271_v0 = vmov 0   ;;  %v211_v2 = vld [vmem:[%s1413_s25] sm:$0xff]  ;;  %v212_v3 = vld [vmem:[%s1413_s25 + $0x8] sm:$0xff]  ;;  %s1480_s27 = scalar_lea.vmem [#allocation5], %s1067_s20 }
  0x4f   : > { %1141 = vset.pattern.permute.xlu0 %v1271_v0  ;;  %v213_v4 = vld [vmem:[%s1413_s25 + $0x10] sm:$0xff]  ;;  %v214_v5 = vld [vmem:[%s1413_s25 + $0x18] sm:$0xff]  ;;  %v215_v6 = vld [vmem:[%s1413_s25 + $0x20] sm:$0xff]  ;;  %s926_s5 = scalar_lea.sflag [#allocation4], %s1407_s19  ;;  %s933_s30 = smul.u32 (%p1352_p9), 236, %s1252_s12 }
  0x50   : > { %s203_s6 = scalar_select %p202_p12, %s1256_s13, 1  ;;  %v216_v7 = vld [vmem:[%s1413_s25 + $0x28] sm:$0xff]  ;;  %v217_v8 = vld [vmem:[%s1413_s25 + $0x30] sm:$0xff]  ;;  %v218_v9 = vld [vmem:[%s1413_s25 + $0x38] sm:$0xff] }
  0x51   : > { %v219_v10 = vld [vmem:[%s1413_s25 + $0x40] sm:$0xff]  ;;  %v220_v11 = vld [vmem:[%s1413_s25 + $0x48] sm:$0xff]  ;;  %v221_v12 = vld [vmem:[%s1413_s25 + $0x50] sm:$0xff]  ;;  %s934_s4 = ssub.s32 (%p1352_p9), 706, %s933_s30 }
  0x52   : > { %s1057_s23 = sshll.u32 %s203_s6, 3  ;;  %v222_v13 = vld [vmem:[%s1413_s25 + $0x58] sm:$0xff]  ;;  %v223_v14 = vld [vmem:[%s1413_s25 + $0x60] sm:$0xff]  ;;  %v224_v15 = vld [vmem:[%s1413_s25 + $0x68] sm:$0xff]  ;;  %p935_p8 = scmp.lt.s32.totalorder (%p1352_p9), %s934_s4, 236 }
  0x53   : > { %s205_s26 = scalar_lea.vmem %s2709_s1, %s1057_s23  ;;  %v225_v16 = vld [vmem:[%s1413_s25 + $0x70] sm:$0xff]  ;;  %v226_v17 = vld [vmem:[%s1413_s25 + $0x78] sm:$0xff]  ;;  %v227_v19 = vld [vmem:[%s1413_s25 + $0x80] sm:$0xff] }
  0x54   : > { %v447_v1 = vld [vmem:[%s205_s26] sm:$0xff]  ;;  %v228_v20 = vld [vmem:[%s1413_s25 + $0x88] sm:$0xff]  ;;  %v229_v21 = vld [vmem:[%s1413_s25 + $0x90] sm:$0xff] }
  0x55   : > { %450 = vperm.xlu0 %1141, %v447_v1   ;;  %v230_v22 = vld [vmem:[%s1413_s25 + $0x98] sm:$0xff]  ;;  %v231_v23 = vld [vmem:[%s1413_s25 + $0xa0] sm:$0xff]  ;;  %v232_v24 = vld [vmem:[%s1413_s25 + $0xa8] sm:$0xff] }
  0x56   : > { %v233_v25 = vld [vmem:[%s1413_s25 + $0xb0] sm:$0xff]  ;;  %v234_v26 = vld [vmem:[%s1413_s25 + $0xb8] sm:$0xff]  ;;  %v235_v31 = vld [vmem:[%s1413_s25 + $0xc0] sm:$0xff] }
  0x57   : > { %v236_v32 = vld [vmem:[%s1413_s25 + $0xc8] sm:$0xff]  ;;  %v237_v33 = vld [vmem:[%s1413_s25 + $0xd0] sm:$0xff]  ;;  %v238_v34 = vld [vmem:[%s1413_s25 + $0xd8] sm:$0xff] }
  0x58   : > { %v1463_v39 = vld [vmem:[%s1413_s25 + $0xe0] sm:$0xff]  ;;  %v1466_v40 = vld [vmem:[%s1413_s25 + $0xe8] sm:$0xff]  ;;  %v1469_v41 = vld [vmem:[%s1413_s25 + $0xf0] sm:$0xff] }
  0x59   : > { %v1472_v42 = vld [vmem:[%s1413_s25 + $0xf8] sm:$0xff]  ;;  %v1487_v47 = vld [vmem:[%s1413_s25 + $0x100] sm:$0xff]  ;;  %v1490_v48 = vld [vmem:[%s1413_s25 + $0x108] sm:$0xff] }
  0x5a   : > { %v1493_v49 = vld [vmem:[%s1413_s25 + $0x110] sm:$0xff]  ;;  %v1496_v50 = vld [vmem:[%s1413_s25 + $0x118] sm:$0xff]  ;;  %v1507_v55 = vld [vmem:[%s1413_s25 + $0x120] sm:$0xff] }
  0x5b   : > { %v1510_v56 = vld [vmem:[%s1413_s25 + $0x128] sm:$0xff]  ;;  %v1513_v57 = vld [vmem:[%s1413_s25 + $0x130] sm:$0xff]  ;;  %v1516_v58 = vld [vmem:[%s1413_s25 + $0x138] sm:$0xff] }
  0x5c   : > { %v1527_v63 = vld [vmem:[%s1413_s25 + $0x140] sm:$0xff]  ;;  %v1530_v0 = vld [vmem:[%s1413_s25 + $0x148] sm:$0xff]  ;;  %v1533_v1 = vld [vmem:[%s1413_s25 + $0x150] sm:$0xff] }
  0xd4   : > { %v1440_v18 = vpop.permute.xlu0 %450 }
  0xd5   : > { %v453_v27 = vmul.f32 %v1440_v18, %v211_v2  ;;  %v454_v28 = vmul.f32 %v1440_v18, %v212_v3  ;;  %v455_v29 = vmul.f32 %v1440_v18, %v213_v4  ;;  %v456_v30 = vmul.f32 %v1440_v18, %v214_v5  ;;  %v1536_v2 = vld [vmem:[%s1413_s25 + $0x158] sm:$0xff] }
  0xd6   : > { %v457_v35 = vmul.f32 %v1440_v18, %v215_v6  ;;  %v458_v36 = vmul.f32 %v1440_v18, %v216_v7  ;;  %v459_v37 = vmul.f32 %v1440_v18, %v217_v8  ;;  %v460_v38 = vmul.f32 %v1440_v18, %v218_v9  ;;  %v1547_v7 = vld [vmem:[%s1413_s25 + $0x160] sm:$0xff]  ;;  %v1550_v8 = vld [vmem:[%s1413_s25 + $0x168] sm:$0xff]  ;;  %v1553_v9 = vld [vmem:[%s1413_s25 + $0x170] sm:$0xff] }
  0xd7   : > { %v461_v43 = vmul.f32 %v1440_v18, %v219_v10  ;;  %v462_v44 = vmul.f32 %v1440_v18, %v220_v11  ;;  %v463_v45 = vmul.f32 %v1440_v18, %v221_v12  ;;  %v464_v46 = vmul.f32 %v1440_v18, %v222_v13  ;;  %689 = vst [vmem:[%s1480_s27] sm:$0xff] %v453_v27  ;;  %v1556_v10 = vld [vmem:[%s1413_s25 + $0x178] sm:$0xff] }
  0xd8   : > { %690 = vst [vmem:[%s1480_s27 + $0x8] sm:$0xff] %v454_v28  ;;  %691 = vst [vmem:[%s1480_s27 + $0x10] sm:$0xff] %v455_v29  ;;  %v465_v51 = vmul.f32 %v1440_v18, %v223_v14  ;;  %v466_v52 = vmul.f32 %v1440_v18, %v224_v15  ;;  %v467_v53 = vmul.f32 %v1440_v18, %v225_v16  ;;  %v1567_v15 = vld [vmem:[%s1413_s25 + $0x180] sm:$0xff]  ;;  %v1570_v16 = vld [vmem:[%s1413_s25 + $0x188] sm:$0xff] }
  0xd9   : > { %692 = vst [vmem:[%s1480_s27 + $0x18] sm:$0xff] %v456_v30  ;;  %v468_v54 = vmul.f32 %v1440_v18, %v226_v17  ;;  %693 = vst [vmem:[%s1480_s27 + $0x20] sm:$0xff] %v457_v35  ;;  %v469_v59 = vmul.f32 %v1440_v18, %v227_v19  ;;  %v470_v60 = vmul.f32 %v1440_v18, %v228_v20  ;;  %v1573_v17 = vld [vmem:[%s1413_s25 + $0x190] sm:$0xff]  ;;  %v1576_v19 = vld [vmem:[%s1413_s25 + $0x198] sm:$0xff] }
  0xda   : > { %694 = vst [vmem:[%s1480_s27 + $0x28] sm:$0xff] %v458_v36  ;;  %695 = vst [vmem:[%s1480_s27 + $0x30] sm:$0xff] %v459_v37  ;;  %v471_v61 = vmul.f32 %v1440_v18, %v229_v21  ;;  %v472_v62 = vmul.f32 %v1440_v18, %v230_v22  ;;  %v473_v3 = vmul.f32 %v1440_v18, %v231_v23  ;;  %v1600_v27 = vld [vmem:[%s1413_s25 + $0x1b8] sm:$0xff] }
  0xdb   : > { %696 = vst [vmem:[%s1480_s27 + $0x38] sm:$0xff] %v460_v38  ;;  %697 = vst [vmem:[%s1480_s27 + $0x40] sm:$0xff] %v461_v43  ;;  %v474_v4 = vmul.f32 %v1440_v18, %v232_v24  ;;  %v475_v5 = vmul.f32 %v1440_v18, %v233_v25  ;;  %v476_v6 = vmul.f32 %v1440_v18, %v234_v26  ;;  %v1591_v24 = vld [vmem:[%s1413_s25 + $0x1a0] sm:$0xff]  ;;  %v1594_v25 = vld [vmem:[%s1413_s25 + $0x1a8] sm:$0xff] }
  0xdc   : > { %698 = vst [vmem:[%s1480_s27 + $0x48] sm:$0xff] %v462_v44  ;;  %699 = vst [vmem:[%s1480_s27 + $0x50] sm:$0xff] %v463_v45  ;;  %v477_v11 = vmul.f32 %v1440_v18, %v235_v31  ;;  %v478_v12 = vmul.f32 %v1440_v18, %v236_v32  ;;  %v479_v13 = vmul.f32 %v1440_v18, %v237_v33  ;;  %v1597_v26 = vld [vmem:[%s1413_s25 + $0x1b0] sm:$0xff]  ;;  %v1615_v32 = vld [vmem:[%s1413_s25 + $0x1c0] sm:$0xff] }
  0xdd   : > { %700 = vst [vmem:[%s1480_s27 + $0x58] sm:$0xff] %v464_v46  ;;  %701 = vst [vmem:[%s1480_s27 + $0x60] sm:$0xff] %v465_v51  ;;  %v480_v14 = vmul.f32 %v1440_v18, %v238_v34  ;;  %v481_v20 = vmul.f32 %v1440_v18, %v1463_v39  ;;  %v482_v21 = vmul.f32 %v1440_v18, %v1466_v40  ;;  %v1618_v33 = vld [vmem:[%s1413_s25 + $0x1c8] sm:$0xff]  ;;  %v1621_v34 = vld [vmem:[%s1413_s25 + $0x1d0] sm:$0xff] }
  0xde   : > { %702 = vst [vmem:[%s1480_s27 + $0x68] sm:$0xff] %v466_v52  ;;  %703 = vst [vmem:[%s1480_s27 + $0x70] sm:$0xff] %v467_v53  ;;  %v483_v22 = vmul.f32 %v1440_v18, %v1469_v41  ;;  %v484_v23 = vmul.f32 %v1440_v18, %v1472_v42  ;;  %v485_v28 = vmul.f32 %v1440_v18, %v1487_v47  ;;  %v1624_v35 = vld [vmem:[%s1413_s25 + $0x1d8] sm:$0xff]  ;;  %v1639_v40 = vld [vmem:[%s1413_s25 + $0x1e0] sm:$0xff] }
  0xdf   : > { %704 = vst [vmem:[%s1480_s27 + $0x78] sm:$0xff] %v468_v54  ;;  %705 = vst [vmem:[%s1480_s27 + $0x80] sm:$0xff] %v469_v59  ;;  %v486_v29 = vmul.f32 %v1440_v18, %v1490_v48  ;;  %v487_v30 = vmul.f32 %v1440_v18, %v1493_v49  ;;  %v488_v31 = vmul.f32 %v1440_v18, %v1496_v50  ;;  %v1642_v41 = vld [vmem:[%s1413_s25 + $0x1e8] sm:$0xff]  ;;  %v1645_v42 = vld [vmem:[%s1413_s25 + $0x1f0] sm:$0xff] }
  0xe0   : > { %706 = vst [vmem:[%s1480_s27 + $0x88] sm:$0xff] %v470_v60  ;;  %707 = vst [vmem:[%s1480_s27 + $0x90] sm:$0xff] %v471_v61  ;;  %v489_v36 = vmul.f32 %v1440_v18, %v1507_v55  ;;  %v490_v37 = vmul.f32 %v1440_v18, %v1510_v56  ;;  %v491_v38 = vmul.f32 %v1440_v18, %v1513_v57  ;;  %v1648_v43 = vld [vmem:[%s1413_s25 + $0x1f8] sm:$0xff]  ;;  %v1663_v48 = vld [vmem:[%s1413_s25 + $0x200] sm:$0xff] }
  0xe1   : > { %708 = vst [vmem:[%s1480_s27 + $0x98] sm:$0xff] %v472_v62  ;;  %709 = vst [vmem:[%s1480_s27 + $0xa0] sm:$0xff] %v473_v3  ;;  %v492_v39 = vmul.f32 %v1440_v18, %v1516_v58  ;;  %v493_v44 = vmul.f32 %v1440_v18, %v1527_v63  ;;  %v494_v45 = vmul.f32 %v1440_v18, %v1530_v0  ;;  %v1666_v49 = vld [vmem:[%s1413_s25 + $0x208] sm:$0xff]  ;;  %v1669_v50 = vld [vmem:[%s1413_s25 + $0x210] sm:$0xff] }
  0xe2   : > { %710 = vst [vmem:[%s1480_s27 + $0xa8] sm:$0xff] %v474_v4  ;;  %711 = vst [vmem:[%s1480_s27 + $0xb0] sm:$0xff] %v475_v5  ;;  %v495_v46 = vmul.f32 %v1440_v18, %v1533_v1  ;;  %v496_v47 = vmul.f32 %v1440_v18, %v1536_v2  ;;  %v1672_v51 = vld [vmem:[%s1413_s25 + $0x218] sm:$0xff]  ;;  %v497_v52 = vmul.f32 %v1440_v18, %v1547_v7  ;;  %v1687_v56 = vld [vmem:[%s1413_s25 + $0x220] sm:$0xff] }
  0xe3   : > { %712 = vst [vmem:[%s1480_s27 + $0xb8] sm:$0xff] %v476_v6  ;;  %713 = vst [vmem:[%s1480_s27 + $0xc0] sm:$0xff] %v477_v11  ;;  %v498_v53 = vmul.f32 %v1440_v18, %v1550_v8  ;;  %v499_v54 = vmul.f32 %v1440_v18, %v1553_v9  ;;  %v500_v55 = vmul.f32 %v1440_v18, %v1556_v10  ;;  %v1690_v57 = vld [vmem:[%s1413_s25 + $0x228] sm:$0xff]  ;;  %v1693_v58 = vld [vmem:[%s1413_s25 + $0x230] sm:$0xff] }
  0xe4   : > { %714 = vst [vmem:[%s1480_s27 + $0xc8] sm:$0xff] %v478_v12  ;;  %715 = vst [vmem:[%s1480_s27 + $0xd0] sm:$0xff] %v479_v13  ;;  %v1696_v59 = vld [vmem:[%s1413_s25 + $0x238] sm:$0xff]  ;;  %v501_v60 = vmul.f32 %v1440_v18, %v1567_v15  ;;  %v502_v61 = vmul.f32 %v1440_v18, %v1570_v16  ;;  %v503_v62 = vmul.f32 %v1440_v18, %v1573_v17  ;;  %v1711_v0 = vld [vmem:[%s1413_s25 + $0x240] sm:$0xff] }
  0xe5   : > { %716 = vst [vmem:[%s1480_s27 + $0xd8] sm:$0xff] %v480_v14  ;;  %717 = vst [vmem:[%s1480_s27 + $0xe0] sm:$0xff] %v481_v20  ;;  %v504_v63 = vmul.f32 %v1440_v18, %v1576_v19  ;;  %v1714_v1 = vld [vmem:[%s1413_s25 + $0x248] sm:$0xff]  ;;  %v1717_v2 = vld [vmem:[%s1413_s25 + $0x250] sm:$0xff]  ;;  %v505_v4 = vmul.f32 %v1440_v18, %v1591_v24  ;;  %v506_v5 = vmul.f32 %v1440_v18, %v1594_v25 }
  0xe6   : > { %718 = vst [vmem:[%s1480_s27 + $0xe8] sm:$0xff] %v482_v21  ;;  %719 = vst [vmem:[%s1480_s27 + $0xf0] sm:$0xff] %v483_v22  ;;  %v1720_v3 = vld [vmem:[%s1413_s25 + $0x258] sm:$0xff]  ;;  %v507_v6 = vmul.f32 %v1440_v18, %v1597_v26  ;;  %v508_v7 = vmul.f32 %v1440_v18, %v1600_v27  ;;  %v1735_v8 = vld [vmem:[%s1413_s25 + $0x260] sm:$0xff]  ;;  %v509_v12 = vmul.f32 %v1440_v18, %v1615_v32 }
  0xe7   : > { %720 = vst [vmem:[%s1480_s27 + $0xf8] sm:$0xff] %v484_v23  ;;  %721 = vst [vmem:[%s1480_s27 + $0x100] sm:$0xff] %v485_v28  ;;  %v1738_v9 = vld [vmem:[%s1413_s25 + $0x268] sm:$0xff]  ;;  %v1741_v10 = vld [vmem:[%s1413_s25 + $0x270] sm:$0xff]  ;;  %v510_v13 = vmul.f32 %v1440_v18, %v1618_v33  ;;  %v511_v14 = vmul.f32 %v1440_v18, %v1621_v34  ;;  %v512_v15 = vmul.f32 %v1440_v18, %v1624_v35 }
  0xe8   : > { %722 = vst [vmem:[%s1480_s27 + $0x108] sm:$0xff] %v486_v29  ;;  %723 = vst [vmem:[%s1480_s27 + $0x110] sm:$0xff] %v487_v30  ;;  %v1744_v11 = vld [vmem:[%s1413_s25 + $0x278] sm:$0xff]  ;;  %v1759_v16 = vld [vmem:[%s1413_s25 + $0x280] sm:$0xff]  ;;  %v513_v21 = vmul.f32 %v1440_v18, %v1639_v40  ;;  %v514_v22 = vmul.f32 %v1440_v18, %v1642_v41  ;;  %v515_v23 = vmul.f32 %v1440_v18, %v1645_v42 }
  0xe9   : > { %724 = vst [vmem:[%s1480_s27 + $0x118] sm:$0xff] %v488_v31  ;;  %725 = vst [vmem:[%s1480_s27 + $0x120] sm:$0xff] %v489_v36  ;;  %v1762_v17 = vld [vmem:[%s1413_s25 + $0x288] sm:$0xff]  ;;  %v1765_v19 = vld [vmem:[%s1413_s25 + $0x290] sm:$0xff]  ;;  %v516_v24 = vmul.f32 %v1440_v18, %v1648_v43  ;;  %v517_v29 = vmul.f32 %v1440_v18, %v1663_v48  ;;  %v518_v30 = vmul.f32 %v1440_v18, %v1666_v49 }
  0xea   : > { %726 = vst [vmem:[%s1480_s27 + $0x128] sm:$0xff] %v490_v37  ;;  %727 = vst [vmem:[%s1480_s27 + $0x130] sm:$0xff] %v491_v38  ;;  %v1768_v20 = vld [vmem:[%s1413_s25 + $0x298] sm:$0xff]  ;;  %v1783_v25 = vld [vmem:[%s1413_s25 + $0x2a0] sm:$0xff]  ;;  %v519_v31 = vmul.f32 %v1440_v18, %v1669_v50  ;;  %v520_v32 = vmul.f32 %v1440_v18, %v1672_v51  ;;  %v521_v37 = vmul.f32 %v1440_v18, %v1687_v56 }
  0xeb   : > { %728 = vst [vmem:[%s1480_s27 + $0x138] sm:$0xff] %v492_v39  ;;  %729 = vst [vmem:[%s1480_s27 + $0x140] sm:$0xff] %v493_v44  ;;  %v1786_v26 = vld [vmem:[%s1413_s25 + $0x2a8] sm:$0xff]  ;;  %v1789_v27 = vld [vmem:[%s1413_s25 + $0x2b0] sm:$0xff]  ;;  %v522_v38 = vmul.f32 %v1440_v18, %v1690_v57  ;;  %v523_v39 = vmul.f32 %v1440_v18, %v1693_v58  ;;  %v524_v40 = vmul.f32 %v1440_v18, %v1696_v59 }
  0xec   : > { %730 = vst [vmem:[%s1480_s27 + $0x148] sm:$0xff] %v494_v45  ;;  %731 = vst [vmem:[%s1480_s27 + $0x150] sm:$0xff] %v495_v46  ;;  %v1792_v28 = vld [vmem:[%s1413_s25 + $0x2b8] sm:$0xff]  ;;  %v1807_v33 = vld [vmem:[%s1413_s25 + $0x2c0] sm:$0xff]  ;;  %v525_v45 = vmul.f32 %v1440_v18, %v1711_v0  ;;  %v526_v46 = vmul.f32 %v1440_v18, %v1714_v1  ;;  %v528_v48 = vmul.f32 %v1440_v18, %v1720_v3 }
  0xed   : > { %732 = vst [vmem:[%s1480_s27 + $0x158] sm:$0xff] %v496_v47  ;;  %733 = vst [vmem:[%s1480_s27 + $0x160] sm:$0xff] %v497_v52  ;;  %v1810_v34 = vld [vmem:[%s1413_s25 + $0x2c8] sm:$0xff]  ;;  %v1813_v35 = vld [vmem:[%s1413_s25 + $0x2d0] sm:$0xff]  ;;  %v527_v47 = vmul.f32 %v1440_v18, %v1717_v2  ;;  %v532_v56 = vmul.f32 %v1440_v18, %v1744_v11  ;;  %v536_v0 = vmul.f32 %v1440_v18, %v1768_v20 }
  0xee   : > { %734 = vst [vmem:[%s1480_s27 + $0x168] sm:$0xff] %v498_v53  ;;  %735 = vst [vmem:[%s1480_s27 + $0x170] sm:$0xff] %v499_v54  ;;  %v1816_v36 = vld [vmem:[%s1413_s25 + $0x2d8] sm:$0xff]  ;;  %v1831_v41 = vld [vmem:[%s1413_s25 + $0x2e0] sm:$0xff]  ;;  %v529_v53 = vmul.f32 %v1440_v18, %v1735_v8  ;;  %v530_v54 = vmul.f32 %v1440_v18, %v1738_v9  ;;  %v540_v8 = vmul.f32 %v1440_v18, %v1792_v28 }
  0xef   : > { %736 = vst [vmem:[%s1480_s27 + $0x178] sm:$0xff] %v500_v55  ;;  %737 = vst [vmem:[%s1480_s27 + $0x180] sm:$0xff] %v501_v60  ;;  %v1834_v42 = vld [vmem:[%s1413_s25 + $0x2e8] sm:$0xff]  ;;  %v1837_v43 = vld [vmem:[%s1413_s25 + $0x2f0] sm:$0xff]  ;;  %v531_v55 = vmul.f32 %v1440_v18, %v1741_v10 }
  0xf0   : > { %738 = vst [vmem:[%s1480_s27 + $0x188] sm:$0xff] %v502_v61  ;;  %739 = vst [vmem:[%s1480_s27 + $0x190] sm:$0xff] %v503_v62  ;;  %v1840_v44 = vld [vmem:[%s1413_s25 + $0x2f8] sm:$0xff]  ;;  %v1855_v49 = vld [vmem:[%s1413_s25 + $0x300] sm:$0xff]  ;;  %v533_v61 = vmul.f32 %v1440_v18, %v1759_v16  ;;  %v534_v62 = vmul.f32 %v1440_v18, %v1762_v17  ;;  %v544_v16 = vmul.f32 %v1440_v18, %v1816_v36 }
  0xf1   : > { %740 = vst [vmem:[%s1480_s27 + $0x198] sm:$0xff] %v504_v63  ;;  %741 = vst [vmem:[%s1480_s27 + $0x1a0] sm:$0xff] %v505_v4  ;;  %v1858_v50 = vld [vmem:[%s1413_s25 + $0x308] sm:$0xff]  ;;  %v1861_v51 = vld [vmem:[%s1413_s25 + $0x310] sm:$0xff]  ;;  %v535_v63 = vmul.f32 %v1440_v18, %v1765_v19 }
  0xf2   : > { %742 = vst [vmem:[%s1480_s27 + $0x1a8] sm:$0xff] %v506_v5  ;;  %743 = vst [vmem:[%s1480_s27 + $0x1b0] sm:$0xff] %v507_v6  ;;  %v1864_v52 = vld [vmem:[%s1413_s25 + $0x318] sm:$0xff]  ;;  %v1879_v57 = vld [vmem:[%s1413_s25 + $0x320] sm:$0xff]  ;;  %v537_v5 = vmul.f32 %v1440_v18, %v1783_v25  ;;  %v538_v6 = vmul.f32 %v1440_v18, %v1786_v26  ;;  %v548_v25 = vmul.f32 %v1440_v18, %v1840_v44 }
  0xf3   : > { %744 = vst [vmem:[%s1480_s27 + $0x1b8] sm:$0xff] %v508_v7  ;;  %745 = vst [vmem:[%s1480_s27 + $0x1c0] sm:$0xff] %v509_v12  ;;  %v1882_v58 = vld [vmem:[%s1413_s25 + $0x328] sm:$0xff]  ;;  %v1885_v59 = vld [vmem:[%s1413_s25 + $0x330] sm:$0xff]  ;;  %v539_v7 = vmul.f32 %v1440_v18, %v1789_v27 }
  0xf4   : > { %746 = vst [vmem:[%s1480_s27 + $0x1c8] sm:$0xff] %v510_v13  ;;  %747 = vst [vmem:[%s1480_s27 + $0x1d0] sm:$0xff] %v511_v14  ;;  %v1888_v60 = vld [vmem:[%s1413_s25 + $0x338] sm:$0xff]  ;;  %v1903_v1 = vld [vmem:[%s1413_s25 + $0x340] sm:$0xff]  ;;  %v541_v13 = vmul.f32 %v1440_v18, %v1807_v33  ;;  %v542_v14 = vmul.f32 %v1440_v18, %v1810_v34  ;;  %v552_v33 = vmul.f32 %v1440_v18, %v1864_v52 }
  0xf5   : > { %748 = vst [vmem:[%s1480_s27 + $0x1d8] sm:$0xff] %v512_v15  ;;  %749 = vst [vmem:[%s1480_s27 + $0x1e0] sm:$0xff] %v513_v21  ;;  %v1906_v2 = vld [vmem:[%s1413_s25 + $0x348] sm:$0xff]  ;;  %v1909_v3 = vld [vmem:[%s1413_s25 + $0x350] sm:$0xff]  ;;  %v543_v15 = vmul.f32 %v1440_v18, %v1813_v35 }
  0xf6   : > { %750 = vst [vmem:[%s1480_s27 + $0x1e8] sm:$0xff] %v514_v22  ;;  %751 = vst [vmem:[%s1480_s27 + $0x1f0] sm:$0xff] %v515_v23  ;;  %v1912_v4 = vld [vmem:[%s1413_s25 + $0x358] sm:$0xff]  ;;  %v1927_v9 = vld [vmem:[%s1413_s25 + $0x360] sm:$0xff]  ;;  %v545_v22 = vmul.f32 %v1440_v18, %v1831_v41  ;;  %v546_v23 = vmul.f32 %v1440_v18, %v1834_v42  ;;  %v556_v41 = vmul.f32 %v1440_v18, %v1888_v60 }
  0xf7   : > { %752 = vst [vmem:[%s1480_s27 + $0x1f8] sm:$0xff] %v516_v24  ;;  %753 = vst [vmem:[%s1480_s27 + $0x200] sm:$0xff] %v517_v29  ;;  %v1930_v10 = vld [vmem:[%s1413_s25 + $0x368] sm:$0xff]  ;;  %v1933_v11 = vld [vmem:[%s1413_s25 + $0x370] sm:$0xff]  ;;  %v547_v24 = vmul.f32 %v1440_v18, %v1837_v43 }
  0xf8   : > { %754 = vst [vmem:[%s1480_s27 + $0x208] sm:$0xff] %v518_v30  ;;  %755 = vst [vmem:[%s1480_s27 + $0x210] sm:$0xff] %v519_v31  ;;  %v1936_v12 = vld [vmem:[%s1413_s25 + $0x378] sm:$0xff]  ;;  %v1951_v17 = vld [vmem:[%s1413_s25 + $0x380] sm:$0xff]  ;;  %v549_v30 = vmul.f32 %v1440_v18, %v1855_v49  ;;  %v550_v31 = vmul.f32 %v1440_v18, %v1858_v50  ;;  %v560_v49 = vmul.f32 %v1440_v18, %v1912_v4 }
  0xf9   : > { %756 = vst [vmem:[%s1480_s27 + $0x218] sm:$0xff] %v520_v32  ;;  %757 = vst [vmem:[%s1480_s27 + $0x220] sm:$0xff] %v521_v37  ;;  %v1954_v19 = vld [vmem:[%s1413_s25 + $0x388] sm:$0xff]  ;;  %v1957_v20 = vld [vmem:[%s1413_s25 + $0x390] sm:$0xff]  ;;  %v551_v32 = vmul.f32 %v1440_v18, %v1861_v51 }
  0xfa   : > { %758 = vst [vmem:[%s1480_s27 + $0x228] sm:$0xff] %v522_v38  ;;  %759 = vst [vmem:[%s1480_s27 + $0x230] sm:$0xff] %v523_v39  ;;  %v1960_v21 = vld [vmem:[%s1413_s25 + $0x398] sm:$0xff]  ;;  %v1975_v26 = vld [vmem:[%s1413_s25 + $0x3a0] sm:$0xff]  ;;  %v553_v38 = vmul.f32 %v1440_v18, %v1879_v57  ;;  %v554_v39 = vmul.f32 %v1440_v18, %v1882_v58  ;;  %v564_v57 = vmul.f32 %v1440_v18, %v1936_v12 }
  0xfb   : > { %760 = vst [vmem:[%s1480_s27 + $0x238] sm:$0xff] %v524_v40  ;;  %761 = vst [vmem:[%s1480_s27 + $0x240] sm:$0xff] %v525_v45  ;;  %v1978_v27 = vld [vmem:[%s1413_s25 + $0x3a8] sm:$0xff]  ;;  %v1981_v28 = vld [vmem:[%s1413_s25 + $0x3b0] sm:$0xff]  ;;  %v555_v40 = vmul.f32 %v1440_v18, %v1885_v59 }
  0xfc   : > { %762 = vst [vmem:[%s1480_s27 + $0x248] sm:$0xff] %v526_v46  ;;  %763 = vst [vmem:[%s1480_s27 + $0x250] sm:$0xff] %v527_v47  ;;  %v1984_v29 = vld [vmem:[%s1413_s25 + $0x3b8] sm:$0xff]  ;;  %v1999_v34 = vld [vmem:[%s1413_s25 + $0x3c0] sm:$0xff]  ;;  %v557_v46 = vmul.f32 %v1440_v18, %v1903_v1  ;;  %v558_v47 = vmul.f32 %v1440_v18, %v1906_v2  ;;  %v568_v1 = vmul.f32 %v1440_v18, %v1960_v21 }
  0xfd   : > { %764 = vst [vmem:[%s1480_s27 + $0x258] sm:$0xff] %v528_v48  ;;  %765 = vst [vmem:[%s1480_s27 + $0x260] sm:$0xff] %v529_v53  ;;  %v2002_v35 = vld [vmem:[%s1413_s25 + $0x3c8] sm:$0xff]  ;;  %v2005_v36 = vld [vmem:[%s1413_s25 + $0x3d0] sm:$0xff]  ;;  %v559_v48 = vmul.f32 %v1440_v18, %v1909_v3 }
  0xfe   : > { %766 = vst [vmem:[%s1480_s27 + $0x268] sm:$0xff] %v530_v54  ;;  %767 = vst [vmem:[%s1480_s27 + $0x270] sm:$0xff] %v531_v55  ;;  %v2008_v37 = vld [vmem:[%s1413_s25 + $0x3d8] sm:$0xff]  ;;  %v2023_v42 = vld [vmem:[%s1413_s25 + $0x3e0] sm:$0xff]  ;;  %v561_v54 = vmul.f32 %v1440_v18, %v1927_v9  ;;  %v562_v55 = vmul.f32 %v1440_v18, %v1930_v10  ;;  %v572_v9 = vmul.f32 %v1440_v18, %v1984_v29 }
  0xff   : > { %768 = vst [vmem:[%s1480_s27 + $0x278] sm:$0xff] %v532_v56  ;;  %769 = vst [vmem:[%s1480_s27 + $0x280] sm:$0xff] %v533_v61  ;;  %v2026_v43 = vld [vmem:[%s1413_s25 + $0x3e8] sm:$0xff]  ;;  %v2029_v44 = vld [vmem:[%s1413_s25 + $0x3f0] sm:$0xff]  ;;  %v563_v56 = vmul.f32 %v1440_v18, %v1933_v11 }
 0x100   : > { %770 = vst [vmem:[%s1480_s27 + $0x288] sm:$0xff] %v534_v62  ;;  %771 = vst [vmem:[%s1480_s27 + $0x290] sm:$0xff] %v535_v63  ;;  %v2032_v45 = vld [vmem:[%s1413_s25 + $0x3f8] sm:$0xff]  ;;  %v2047_v50 = vld [vmem:[%s1413_s25 + $0x400] sm:$0xff]  ;;  %v565_v62 = vmul.f32 %v1440_v18, %v1951_v17  ;;  %v566_v63 = vmul.f32 %v1440_v18, %v1954_v19  ;;  %v576_v17 = vmul.f32 %v1440_v18, %v2008_v37 }
 0x101   : > { %772 = vst [vmem:[%s1480_s27 + $0x298] sm:$0xff] %v536_v0  ;;  %773 = vst [vmem:[%s1480_s27 + $0x2a0] sm:$0xff] %v537_v5  ;;  %v2050_v51 = vld [vmem:[%s1413_s25 + $0x408] sm:$0xff]  ;;  %v2053_v52 = vld [vmem:[%s1413_s25 + $0x410] sm:$0xff]  ;;  %v567_v0 = vmul.f32 %v1440_v18, %v1957_v20 }
 0x102   : > { %774 = vst [vmem:[%s1480_s27 + $0x2a8] sm:$0xff] %v538_v6  ;;  %775 = vst [vmem:[%s1480_s27 + $0x2b0] sm:$0xff] %v539_v7  ;;  %v2056_v53 = vld [vmem:[%s1413_s25 + $0x418] sm:$0xff]  ;;  %v2071_v58 = vld [vmem:[%s1413_s25 + $0x420] sm:$0xff]  ;;  %v569_v6 = vmul.f32 %v1440_v18, %v1975_v26  ;;  %v570_v7 = vmul.f32 %v1440_v18, %v1978_v27  ;;  %v580_v26 = vmul.f32 %v1440_v18, %v2032_v45 }
 0x103   : > { %776 = vst [vmem:[%s1480_s27 + $0x2b8] sm:$0xff] %v540_v8  ;;  %777 = vst [vmem:[%s1480_s27 + $0x2c0] sm:$0xff] %v541_v13  ;;  %v2074_v59 = vld [vmem:[%s1413_s25 + $0x428] sm:$0xff]  ;;  %v2077_v60 = vld [vmem:[%s1413_s25 + $0x430] sm:$0xff]  ;;  %v571_v8 = vmul.f32 %v1440_v18, %v1981_v28 }
 0x104   : > { %778 = vst [vmem:[%s1480_s27 + $0x2c8] sm:$0xff] %v542_v14  ;;  %779 = vst [vmem:[%s1480_s27 + $0x2d0] sm:$0xff] %v543_v15  ;;  %v2080_v61 = vld [vmem:[%s1413_s25 + $0x438] sm:$0xff]  ;;  %v2095_v2 = vld [vmem:[%s1413_s25 + $0x440] sm:$0xff]  ;;  %v573_v14 = vmul.f32 %v1440_v18, %v1999_v34  ;;  %v574_v15 = vmul.f32 %v1440_v18, %v2002_v35  ;;  %v584_v34 = vmul.f32 %v1440_v18, %v2056_v53 }
 0x105   : > { %780 = vst [vmem:[%s1480_s27 + $0x2d8] sm:$0xff] %v544_v16  ;;  %781 = vst [vmem:[%s1480_s27 + $0x2e0] sm:$0xff] %v545_v22  ;;  %v2098_v3 = vld [vmem:[%s1413_s25 + $0x448] sm:$0xff]  ;;  %v2101_v4 = vld [vmem:[%s1413_s25 + $0x450] sm:$0xff]  ;;  %v575_v16 = vmul.f32 %v1440_v18, %v2005_v36 }
 0x106   : > { %782 = vst [vmem:[%s1480_s27 + $0x2e8] sm:$0xff] %v546_v23  ;;  %783 = vst [vmem:[%s1480_s27 + $0x2f0] sm:$0xff] %v547_v24  ;;  %v2104_v5 = vld [vmem:[%s1413_s25 + $0x458] sm:$0xff]  ;;  %v2119_v10 = vld [vmem:[%s1413_s25 + $0x460] sm:$0xff]  ;;  %v577_v23 = vmul.f32 %v1440_v18, %v2023_v42  ;;  %v578_v24 = vmul.f32 %v1440_v18, %v2026_v43  ;;  %v588_v42 = vmul.f32 %v1440_v18, %v2080_v61 }
 0x107   : > { %784 = vst [vmem:[%s1480_s27 + $0x2f8] sm:$0xff] %v548_v25  ;;  %785 = vst [vmem:[%s1480_s27 + $0x300] sm:$0xff] %v549_v30  ;;  %v2122_v11 = vld [vmem:[%s1413_s25 + $0x468] sm:$0xff]  ;;  %v2125_v12 = vld [vmem:[%s1413_s25 + $0x470] sm:$0xff]  ;;  %v579_v25 = vmul.f32 %v1440_v18, %v2029_v44 }
 0x108   : > { %786 = vst [vmem:[%s1480_s27 + $0x308] sm:$0xff] %v550_v31  ;;  %787 = vst [vmem:[%s1480_s27 + $0x310] sm:$0xff] %v551_v32  ;;  %v2128_v13 = vld [vmem:[%s1413_s25 + $0x478] sm:$0xff]  ;;  %v2143_v19 = vld [vmem:[%s1413_s25 + $0x480] sm:$0xff]  ;;  %v581_v31 = vmul.f32 %v1440_v18, %v2047_v50  ;;  %v582_v32 = vmul.f32 %v1440_v18, %v2050_v51  ;;  %v592_v50 = vmul.f32 %v1440_v18, %v2104_v5 }
 0x109   : > { %788 = vst [vmem:[%s1480_s27 + $0x318] sm:$0xff] %v552_v33  ;;  %789 = vst [vmem:[%s1480_s27 + $0x320] sm:$0xff] %v553_v38  ;;  %v2146_v20 = vld [vmem:[%s1413_s25 + $0x488] sm:$0xff]  ;;  %v2149_v21 = vld [vmem:[%s1413_s25 + $0x490] sm:$0xff]  ;;  %v583_v33 = vmul.f32 %v1440_v18, %v2053_v52 }
 0x10a   : > { %790 = vst [vmem:[%s1480_s27 + $0x328] sm:$0xff] %v554_v39  ;;  %791 = vst [vmem:[%s1480_s27 + $0x330] sm:$0xff] %v555_v40  ;;  %v2152_v22 = vld [vmem:[%s1413_s25 + $0x498] sm:$0xff]  ;;  %v2167_v27 = vld [vmem:[%s1413_s25 + $0x4a0] sm:$0xff]  ;;  %v585_v39 = vmul.f32 %v1440_v18, %v2071_v58  ;;  %v586_v40 = vmul.f32 %v1440_v18, %v2074_v59  ;;  %v596_v58 = vmul.f32 %v1440_v18, %v2128_v13 }
 0x10b   : > { %792 = vst [vmem:[%s1480_s27 + $0x338] sm:$0xff] %v556_v41  ;;  %793 = vst [vmem:[%s1480_s27 + $0x340] sm:$0xff] %v557_v46  ;;  %v2170_v28 = vld [vmem:[%s1413_s25 + $0x4a8] sm:$0xff]  ;;  %v2173_v29 = vld [vmem:[%s1413_s25 + $0x4b0] sm:$0xff]  ;;  %v587_v41 = vmul.f32 %v1440_v18, %v2077_v60 }
 0x10c   : > { %794 = vst [vmem:[%s1480_s27 + $0x348] sm:$0xff] %v558_v47  ;;  %795 = vst [vmem:[%s1480_s27 + $0x350] sm:$0xff] %v559_v48  ;;  %v2176_v30 = vld [vmem:[%s1413_s25 + $0x4b8] sm:$0xff]  ;;  %v2191_v35 = vld [vmem:[%s1413_s25 + $0x4c0] sm:$0xff]  ;;  %v589_v47 = vmul.f32 %v1440_v18, %v2095_v2  ;;  %v590_v48 = vmul.f32 %v1440_v18, %v2098_v3  ;;  %v600_v2 = vmul.f32 %v1440_v18, %v2152_v22 }
 0x10d   : > { %796 = vst [vmem:[%s1480_s27 + $0x358] sm:$0xff] %v560_v49  ;;  %797 = vst [vmem:[%s1480_s27 + $0x360] sm:$0xff] %v561_v54  ;;  %v2194_v36 = vld [vmem:[%s1413_s25 + $0x4c8] sm:$0xff]  ;;  %v2197_v37 = vld [vmem:[%s1413_s25 + $0x4d0] sm:$0xff]  ;;  %v591_v49 = vmul.f32 %v1440_v18, %v2101_v4 }
 0x10e   : > { %798 = vst [vmem:[%s1480_s27 + $0x368] sm:$0xff] %v562_v55  ;;  %799 = vst [vmem:[%s1480_s27 + $0x370] sm:$0xff] %v563_v56  ;;  %v2200_v38 = vld [vmem:[%s1413_s25 + $0x4d8] sm:$0xff]  ;;  %v2215_v43 = vld [vmem:[%s1413_s25 + $0x4e0] sm:$0xff]  ;;  %v593_v55 = vmul.f32 %v1440_v18, %v2119_v10  ;;  %v594_v56 = vmul.f32 %v1440_v18, %v2122_v11  ;;  %v604_v10 = vmul.f32 %v1440_v18, %v2176_v30 }
 0x10f   : > { %800 = vst [vmem:[%s1480_s27 + $0x378] sm:$0xff] %v564_v57  ;;  %801 = vst [vmem:[%s1480_s27 + $0x380] sm:$0xff] %v565_v62  ;;  %v2218_v44 = vld [vmem:[%s1413_s25 + $0x4e8] sm:$0xff]  ;;  %v2221_v45 = vld [vmem:[%s1413_s25 + $0x4f0] sm:$0xff]  ;;  %v595_v57 = vmul.f32 %v1440_v18, %v2125_v12 }
 0x110   : > { %802 = vst [vmem:[%s1480_s27 + $0x388] sm:$0xff] %v566_v63  ;;  %803 = vst [vmem:[%s1480_s27 + $0x390] sm:$0xff] %v567_v0  ;;  %v2224_v46 = vld [vmem:[%s1413_s25 + $0x4f8] sm:$0xff]  ;;  %v2239_v51 = vld [vmem:[%s1413_s25 + $0x500] sm:$0xff]  ;;  %v597_v63 = vmul.f32 %v1440_v18, %v2143_v19  ;;  %v598_v0 = vmul.f32 %v1440_v18, %v2146_v20  ;;  %v608_v19 = vmul.f32 %v1440_v18, %v2200_v38 }
 0x111   : > { %804 = vst [vmem:[%s1480_s27 + $0x398] sm:$0xff] %v568_v1  ;;  %805 = vst [vmem:[%s1480_s27 + $0x3a0] sm:$0xff] %v569_v6  ;;  %v2242_v52 = vld [vmem:[%s1413_s25 + $0x508] sm:$0xff]  ;;  %v2245_v53 = vld [vmem:[%s1413_s25 + $0x510] sm:$0xff]  ;;  %v599_v1 = vmul.f32 %v1440_v18, %v2149_v21 }
 0x112   : > { %806 = vst [vmem:[%s1480_s27 + $0x3a8] sm:$0xff] %v570_v7  ;;  %807 = vst [vmem:[%s1480_s27 + $0x3b0] sm:$0xff] %v571_v8  ;;  %v2248_v54 = vld [vmem:[%s1413_s25 + $0x518] sm:$0xff]  ;;  %v2263_v59 = vld [vmem:[%s1413_s25 + $0x520] sm:$0xff]  ;;  %v601_v7 = vmul.f32 %v1440_v18, %v2167_v27  ;;  %v602_v8 = vmul.f32 %v1440_v18, %v2170_v28  ;;  %v612_v27 = vmul.f32 %v1440_v18, %v2224_v46 }
 0x113   : > { %808 = vst [vmem:[%s1480_s27 + $0x3b8] sm:$0xff] %v572_v9  ;;  %809 = vst [vmem:[%s1480_s27 + $0x3c0] sm:$0xff] %v573_v14  ;;  %v2266_v60 = vld [vmem:[%s1413_s25 + $0x528] sm:$0xff]  ;;  %v2269_v61 = vld [vmem:[%s1413_s25 + $0x530] sm:$0xff]  ;;  %v603_v9 = vmul.f32 %v1440_v18, %v2173_v29 }
 0x114   : > { %810 = vst [vmem:[%s1480_s27 + $0x3c8] sm:$0xff] %v574_v15  ;;  %811 = vst [vmem:[%s1480_s27 + $0x3d0] sm:$0xff] %v575_v16  ;;  %v2272_v62 = vld [vmem:[%s1413_s25 + $0x538] sm:$0xff]  ;;  %v2287_v3 = vld [vmem:[%s1413_s25 + $0x540] sm:$0xff]  ;;  %v605_v15 = vmul.f32 %v1440_v18, %v2191_v35  ;;  %v606_v16 = vmul.f32 %v1440_v18, %v2194_v36  ;;  %v616_v35 = vmul.f32 %v1440_v18, %v2248_v54 }
 0x115   : > { %812 = vst [vmem:[%s1480_s27 + $0x3d8] sm:$0xff] %v576_v17  ;;  %813 = vst [vmem:[%s1480_s27 + $0x3e0] sm:$0xff] %v577_v23  ;;  %v2290_v4 = vld [vmem:[%s1413_s25 + $0x548] sm:$0xff]  ;;  %v2293_v5 = vld [vmem:[%s1413_s25 + $0x550] sm:$0xff]  ;;  %v607_v17 = vmul.f32 %v1440_v18, %v2197_v37 }
 0x116   : > { %814 = vst [vmem:[%s1480_s27 + $0x3e8] sm:$0xff] %v578_v24  ;;  %815 = vst [vmem:[%s1480_s27 + $0x3f0] sm:$0xff] %v579_v25  ;;  %v2296_v6 = vld [vmem:[%s1413_s25 + $0x558] sm:$0xff]  ;;  %v2311_v11 = vld [vmem:[%s1413_s25 + $0x560] sm:$0xff]  ;;  %v609_v24 = vmul.f32 %v1440_v18, %v2215_v43  ;;  %v610_v25 = vmul.f32 %v1440_v18, %v2218_v44  ;;  %v620_v43 = vmul.f32 %v1440_v18, %v2272_v62 }
 0x117   : > { %816 = vst [vmem:[%s1480_s27 + $0x3f8] sm:$0xff] %v580_v26  ;;  %817 = vst [vmem:[%s1480_s27 + $0x400] sm:$0xff] %v581_v31  ;;  %v2314_v12 = vld [vmem:[%s1413_s25 + $0x568] sm:$0xff]  ;;  %v2317_v13 = vld [vmem:[%s1413_s25 + $0x570] sm:$0xff]  ;;  %v611_v26 = vmul.f32 %v1440_v18, %v2221_v45 }
 0x118   : > { %818 = vst [vmem:[%s1480_s27 + $0x408] sm:$0xff] %v582_v32  ;;  %819 = vst [vmem:[%s1480_s27 + $0x410] sm:$0xff] %v583_v33  ;;  %v2320_v14 = vld [vmem:[%s1413_s25 + $0x578] sm:$0xff]  ;;  %v2335_v20 = vld [vmem:[%s1413_s25 + $0x580] sm:$0xff]  ;;  %v613_v32 = vmul.f32 %v1440_v18, %v2239_v51  ;;  %v614_v33 = vmul.f32 %v1440_v18, %v2242_v52  ;;  %v624_v51 = vmul.f32 %v1440_v18, %v2296_v6 }
 0x119   : > { %820 = vst [vmem:[%s1480_s27 + $0x418] sm:$0xff] %v584_v34  ;;  %821 = vst [vmem:[%s1480_s27 + $0x420] sm:$0xff] %v585_v39  ;;  %v2338_v21 = vld [vmem:[%s1413_s25 + $0x588] sm:$0xff]  ;;  %v2341_v22 = vld [vmem:[%s1413_s25 + $0x590] sm:$0xff]  ;;  %v615_v34 = vmul.f32 %v1440_v18, %v2245_v53 }
 0x11a   : > { %822 = vst [vmem:[%s1480_s27 + $0x428] sm:$0xff] %v586_v40  ;;  %823 = vst [vmem:[%s1480_s27 + $0x430] sm:$0xff] %v587_v41  ;;  %v2344_v23 = vld [vmem:[%s1413_s25 + $0x598] sm:$0xff]  ;;  %v2359_v28 = vld [vmem:[%s1413_s25 + $0x5a0] sm:$0xff]  ;;  %v617_v40 = vmul.f32 %v1440_v18, %v2263_v59  ;;  %v618_v41 = vmul.f32 %v1440_v18, %v2266_v60  ;;  %v628_v59 = vmul.f32 %v1440_v18, %v2320_v14 }
 0x11b   : > { %824 = vst [vmem:[%s1480_s27 + $0x438] sm:$0xff] %v588_v42  ;;  %825 = vst [vmem:[%s1480_s27 + $0x440] sm:$0xff] %v589_v47  ;;  %v2362_v29 = vld [vmem:[%s1413_s25 + $0x5a8] sm:$0xff]  ;;  %v2365_v30 = vld [vmem:[%s1413_s25 + $0x5b0] sm:$0xff]  ;;  %v619_v42 = vmul.f32 %v1440_v18, %v2269_v61 }
 0x11c   : > { %826 = vst [vmem:[%s1480_s27 + $0x448] sm:$0xff] %v590_v48  ;;  %827 = vst [vmem:[%s1480_s27 + $0x450] sm:$0xff] %v591_v49  ;;  %v2368_v31 = vld [vmem:[%s1413_s25 + $0x5b8] sm:$0xff]  ;;  %v2383_v36 = vld [vmem:[%s1413_s25 + $0x5c0] sm:$0xff]  ;;  %v621_v48 = vmul.f32 %v1440_v18, %v2287_v3  ;;  %v622_v49 = vmul.f32 %v1440_v18, %v2290_v4  ;;  %v632_v3 = vmul.f32 %v1440_v18, %v2344_v23 }
 0x11d   : > { %828 = vst [vmem:[%s1480_s27 + $0x458] sm:$0xff] %v592_v50  ;;  %829 = vst [vmem:[%s1480_s27 + $0x460] sm:$0xff] %v593_v55  ;;  %v2386_v37 = vld [vmem:[%s1413_s25 + $0x5c8] sm:$0xff]  ;;  %v2389_v38 = vld [vmem:[%s1413_s25 + $0x5d0] sm:$0xff]  ;;  %v623_v50 = vmul.f32 %v1440_v18, %v2293_v5 }
 0x11e   : > { %830 = vst [vmem:[%s1480_s27 + $0x468] sm:$0xff] %v594_v56  ;;  %831 = vst [vmem:[%s1480_s27 + $0x470] sm:$0xff] %v595_v57  ;;  %v2392_v39 = vld [vmem:[%s1413_s25 + $0x5d8] sm:$0xff]  ;;  %v2407_v44 = vld [vmem:[%s1413_s25 + $0x5e0] sm:$0xff]  ;;  %v625_v56 = vmul.f32 %v1440_v18, %v2311_v11  ;;  %v626_v57 = vmul.f32 %v1440_v18, %v2314_v12  ;;  %v636_v11 = vmul.f32 %v1440_v18, %v2368_v31 }
 0x11f   : > { %832 = vst [vmem:[%s1480_s27 + $0x478] sm:$0xff] %v596_v58  ;;  %833 = vst [vmem:[%s1480_s27 + $0x480] sm:$0xff] %v597_v63  ;;  %v2410_v45 = vld [vmem:[%s1413_s25 + $0x5e8] sm:$0xff]  ;;  %v2413_v46 = vld [vmem:[%s1413_s25 + $0x5f0] sm:$0xff]  ;;  %v627_v58 = vmul.f32 %v1440_v18, %v2317_v13 }
 0x120   : > { %834 = vst [vmem:[%s1480_s27 + $0x488] sm:$0xff] %v598_v0  ;;  %835 = vst [vmem:[%s1480_s27 + $0x490] sm:$0xff] %v599_v1  ;;  %v2416_v47 = vld [vmem:[%s1413_s25 + $0x5f8] sm:$0xff]  ;;  %v2431_v52 = vld [vmem:[%s1413_s25 + $0x600] sm:$0xff]  ;;  %v629_v0 = vmul.f32 %v1440_v18, %v2335_v20  ;;  %v630_v1 = vmul.f32 %v1440_v18, %v2338_v21  ;;  %v640_v20 = vmul.f32 %v1440_v18, %v2392_v39 }
 0x121   : > { %836 = vst [vmem:[%s1480_s27 + $0x498] sm:$0xff] %v600_v2  ;;  %837 = vst [vmem:[%s1480_s27 + $0x4a0] sm:$0xff] %v601_v7  ;;  %v2434_v53 = vld [vmem:[%s1413_s25 + $0x608] sm:$0xff]  ;;  %v2437_v54 = vld [vmem:[%s1413_s25 + $0x610] sm:$0xff]  ;;  %v631_v2 = vmul.f32 %v1440_v18, %v2341_v22 }
 0x122   : > { %838 = vst [vmem:[%s1480_s27 + $0x4a8] sm:$0xff] %v602_v8  ;;  %839 = vst [vmem:[%s1480_s27 + $0x4b0] sm:$0xff] %v603_v9  ;;  %v2440_v55 = vld [vmem:[%s1413_s25 + $0x618] sm:$0xff]  ;;  %v407_v60 = vld [vmem:[%s1413_s25 + $0x620] sm:$0xff]  ;;  %v633_v8 = vmul.f32 %v1440_v18, %v2359_v28  ;;  %v634_v9 = vmul.f32 %v1440_v18, %v2362_v29  ;;  %v644_v28 = vmul.f32 %v1440_v18, %v2416_v47 }
 0x123   : > { %840 = vst [vmem:[%s1480_s27 + $0x4b8] sm:$0xff] %v604_v10  ;;  %841 = vst [vmem:[%s1480_s27 + $0x4c0] sm:$0xff] %v605_v15  ;;  %v408_v61 = vld [vmem:[%s1413_s25 + $0x628] sm:$0xff]  ;;  %v409_v62 = vld [vmem:[%s1413_s25 + $0x630] sm:$0xff]  ;;  %v635_v10 = vmul.f32 %v1440_v18, %v2365_v30  ;;  %v649_v39 = vmul.f32 %v1440_v18, %v407_v60 }
 0x124   : > { %842 = vst [vmem:[%s1480_s27 + $0x4c8] sm:$0xff] %v606_v16  ;;  %843 = vst [vmem:[%s1480_s27 + $0x4d0] sm:$0xff] %v607_v17  ;;  %v410_v63 = vld [vmem:[%s1413_s25 + $0x638] sm:$0xff]  ;;  %v411_v4 = vld [vmem:[%s1413_s25 + $0x640] sm:$0xff]  ;;  %v637_v16 = vmul.f32 %v1440_v18, %v2383_v36  ;;  %v638_v17 = vmul.f32 %v1440_v18, %v2386_v37 }
 0x125   : > { %844 = vst [vmem:[%s1480_s27 + $0x4d8] sm:$0xff] %v608_v19  ;;  %845 = vst [vmem:[%s1480_s27 + $0x4e0] sm:$0xff] %v609_v24  ;;  %v412_v5 = vld [vmem:[%s1413_s25 + $0x648] sm:$0xff]  ;;  %v413_v6 = vld [vmem:[%s1413_s25 + $0x650] sm:$0xff]  ;;  %v639_v19 = vmul.f32 %v1440_v18, %v2389_v38 }
 0x126   : > { %846 = vst [vmem:[%s1480_s27 + $0x4e8] sm:$0xff] %v610_v25  ;;  %847 = vst [vmem:[%s1480_s27 + $0x4f0] sm:$0xff] %v611_v26  ;;  %v414_v7 = vld [vmem:[%s1413_s25 + $0x658] sm:$0xff]  ;;  %v415_v12 = vld [vmem:[%s1413_s25 + $0x660] sm:$0xff]  ;;  %v641_v25 = vmul.f32 %v1440_v18, %v2407_v44  ;;  %v642_v26 = vmul.f32 %v1440_v18, %v2410_v45  ;;  %v654_v47 = vmul.f32 %v1440_v18, %v412_v5 }
 0x127   : > { %848 = vst [vmem:[%s1480_s27 + $0x4f8] sm:$0xff] %v612_v27  ;;  %849 = vst [vmem:[%s1480_s27 + $0x500] sm:$0xff] %v613_v32  ;;  %v416_v13 = vld [vmem:[%s1413_s25 + $0x668] sm:$0xff]  ;;  %v417_v14 = vld [vmem:[%s1413_s25 + $0x670] sm:$0xff]  ;;  %v643_v27 = vmul.f32 %v1440_v18, %v2413_v46  ;;  %v645_v32 = vmul.f32 %v1440_v18, %v2431_v52  ;;  %v653_v46 = vmul.f32 %v1440_v18, %v411_v4 }
 0x128   : > { %850 = vst [vmem:[%s1480_s27 + $0x508] sm:$0xff] %v614_v33  ;;  %851 = vst [vmem:[%s1480_s27 + $0x510] sm:$0xff] %v615_v34  ;;  %v418_v15 = vld [vmem:[%s1413_s25 + $0x678] sm:$0xff]  ;;  %v419_v21 = vld [vmem:[%s1413_s25 + $0x680] sm:$0xff]  ;;  %v646_v33 = vmul.f32 %v1440_v18, %v2434_v53  ;;  %v647_v34 = vmul.f32 %v1440_v18, %v2437_v54  ;;  %v657_v53 = vmul.f32 %v1440_v18, %v415_v12 }
 0x129   : > { %852 = vst [vmem:[%s1480_s27 + $0x518] sm:$0xff] %v616_v35  ;;  %853 = vst [vmem:[%s1480_s27 + $0x520] sm:$0xff] %v617_v40  ;;  %v420_v22 = vld [vmem:[%s1413_s25 + $0x688] sm:$0xff]  ;;  %v421_v23 = vld [vmem:[%s1413_s25 + $0x690] sm:$0xff]  ;;  %v648_v35 = vmul.f32 %v1440_v18, %v2440_v55  ;;  %v650_v40 = vmul.f32 %v1440_v18, %v408_v61  ;;  %v658_v54 = vmul.f32 %v1440_v18, %v416_v13 }
 0x12a   : > { %854 = vst [vmem:[%s1480_s27 + $0x528] sm:$0xff] %v618_v41  ;;  %855 = vst [vmem:[%s1480_s27 + $0x530] sm:$0xff] %v619_v42  ;;  %v422_v24 = vld [vmem:[%s1413_s25 + $0x698] sm:$0xff]  ;;  %v423_v29 = vld [vmem:[%s1413_s25 + $0x6a0] sm:$0xff]  ;;  %v651_v41 = vmul.f32 %v1440_v18, %v409_v62  ;;  %v652_v42 = vmul.f32 %v1440_v18, %v410_v63  ;;  %v659_v55 = vmul.f32 %v1440_v18, %v417_v14 }
 0x12b   : > { %856 = vst [vmem:[%s1480_s27 + $0x538] sm:$0xff] %v620_v43  ;;  %857 = vst [vmem:[%s1480_s27 + $0x540] sm:$0xff] %v621_v48  ;;  %v424_v30 = vld [vmem:[%s1413_s25 + $0x6a8] sm:$0xff]  ;;  %v425_v31 = vld [vmem:[%s1413_s25 + $0x6b0] sm:$0xff]  ;;  %v655_v48 = vmul.f32 %v1440_v18, %v413_v6  ;;  %v661_v60 = vmul.f32 %v1440_v18, %v419_v21  ;;  %v662_v61 = vmul.f32 %v1440_v18, %v420_v22 }
 0x12c   : > { %858 = vst [vmem:[%s1480_s27 + $0x548] sm:$0xff] %v622_v49  ;;  %859 = vst [vmem:[%s1480_s27 + $0x550] sm:$0xff] %v623_v50  ;;  %v426_v36 = vld [vmem:[%s1413_s25 + $0x6b8] sm:$0xff]  ;;  %v427_v37 = vld [vmem:[%s1413_s25 + $0x6c0] sm:$0xff]  ;;  %v656_v49 = vmul.f32 %v1440_v18, %v414_v7  ;;  %v663_v62 = vmul.f32 %v1440_v18, %v421_v23  ;;  %v664_v63 = vmul.f32 %v1440_v18, %v422_v24 }
 0x12d   : > { %860 = vst [vmem:[%s1480_s27 + $0x558] sm:$0xff] %v624_v51  ;;  %861 = vst [vmem:[%s1480_s27 + $0x560] sm:$0xff] %v625_v56  ;;  %v428_v38 = vld [vmem:[%s1413_s25 + $0x6c8] sm:$0xff]  ;;  %v429_v43 = vld [vmem:[%s1413_s25 + $0x6d0] sm:$0xff]  ;;  %v660_v56 = vmul.f32 %v1440_v18, %v418_v15  ;;  %v666_v4 = vmul.f32 %v1440_v18, %v424_v30  ;;  %v667_v5 = vmul.f32 %v1440_v18, %v425_v31 }
 0x12e   : > { %862 = vst [vmem:[%s1480_s27 + $0x568] sm:$0xff] %v626_v57  ;;  %863 = vst [vmem:[%s1480_s27 + $0x570] sm:$0xff] %v627_v58  ;;  %v430_v44 = vld [vmem:[%s1413_s25 + $0x6d8] sm:$0xff]  ;;  %v431_v45 = vld [vmem:[%s1413_s25 + $0x6e0] sm:$0xff]  ;;  %v668_v6 = vmul.f32 %v1440_v18, %v426_v36  ;;  %v671_v12 = vmul.f32 %v1440_v18, %v429_v43 }
 0x12f   : > { %864 = vst [vmem:[%s1480_s27 + $0x578] sm:$0xff] %v628_v59  ;;  %865 = vst [vmem:[%s1480_s27 + $0x580] sm:$0xff] %v629_v0  ;;  %v432_v50 = vld [vmem:[%s1413_s25 + $0x6e8] sm:$0xff]  ;;  %v433_v51 = vld [vmem:[%s1413_s25 + $0x6f0] sm:$0xff]  ;;  %v672_v13 = vmul.f32 %v1440_v18, %v430_v44 }
 0x130   : > { %866 = vst [vmem:[%s1480_s27 + $0x588] sm:$0xff] %v630_v1  ;;  %867 = vst [vmem:[%s1480_s27 + $0x590] sm:$0xff] %v631_v2  ;;  %v434_v52 = vld [vmem:[%s1413_s25 + $0x6f8] sm:$0xff]  ;;  %v435_v57 = vld [vmem:[%s1413_s25 + $0x700] sm:$0xff] }
 0x131   : > { %868 = vst [vmem:[%s1480_s27 + $0x598] sm:$0xff] %v632_v3  ;;  %869 = vst [vmem:[%s1480_s27 + $0x5a0] sm:$0xff] %v633_v8  ;;  %v436_v58 = vld [vmem:[%s1413_s25 + $0x708] sm:$0xff]  ;;  %v437_v59 = vld [vmem:[%s1413_s25 + $0x710] sm:$0xff]  ;;  %v665_v3 = vmul.f32 %v1440_v18, %v423_v29  ;;  %v676_v21 = vmul.f32 %v1440_v18, %v434_v52  ;;  %v677_v22 = vmul.f32 %v1440_v18, %v435_v57 }
 0x132   : > { %870 = vst [vmem:[%s1480_s27 + $0x5a8] sm:$0xff] %v634_v9  ;;  %871 = vst [vmem:[%s1480_s27 + $0x5b0] sm:$0xff] %v635_v10  ;;  %v438_v0 = vld [vmem:[%s1413_s25 + $0x718] sm:$0xff]  ;;  %v439_v1 = vld [vmem:[%s1413_s25 + $0x720] sm:$0xff]  ;;  %v669_v10 = vmul.f32 %v1440_v18, %v427_v37  ;;  %v678_v23 = vmul.f32 %v1440_v18, %v436_v58  ;;  %v679_v24 = vmul.f32 %v1440_v18, %v437_v59 }
 0x133   : > { %872 = vst [vmem:[%s1480_s27 + $0x5b8] sm:$0xff] %v636_v11  ;;  %873 = vst [vmem:[%s1480_s27 + $0x5c0] sm:$0xff] %v637_v16  ;;  %v440_v2 = vld [vmem:[%s1413_s25 + $0x728] sm:$0xff]  ;;  %v441_v7 = vld [vmem:[%s1413_s25 + $0x730] sm:$0xff]  ;;  %v670_v11 = vmul.f32 %v1440_v18, %v428_v38 }
 0x134   : > { %874 = vst [vmem:[%s1480_s27 + $0x5c8] sm:$0xff] %v638_v17  ;;  %875 = vst [vmem:[%s1480_s27 + $0x5d0] sm:$0xff] %v639_v19  ;;  %v442_v8 = vld [vmem:[%s1413_s25 + $0x738] sm:$0xff]  ;;  %v443_v9 = vld [vmem:[%s1413_s25 + $0x740] sm:$0xff]  ;;  %v673_v17 = vmul.f32 %v1440_v18, %v431_v45  ;;  %v674_v19 = vmul.f32 %v1440_v18, %v432_v50 }
 0x135   : > { %876 = vst [vmem:[%s1480_s27 + $0x5d8] sm:$0xff] %v640_v20  ;;  %877 = vst [vmem:[%s1480_s27 + $0x5e0] sm:$0xff] %v641_v25  ;;  %v444_v14 = vld [vmem:[%s1413_s25 + $0x748] sm:$0xff]  ;;  %v445_v15 = vld [vmem:[%s1413_s25 + $0x750] sm:$0xff]  ;;  %v675_v20 = vmul.f32 %v1440_v18, %v433_v51  ;;  %v680_v25 = vmul.f32 %v1440_v18, %v438_v0  ;;  %v684_v29 = vmul.f32 %v1440_v18, %v442_v8 }
 0x136   : > { %878 = vst [vmem:[%s1480_s27 + $0x5e8] sm:$0xff] %v642_v26  ;;  %879 = vst [vmem:[%s1480_s27 + $0x5f0] sm:$0xff] %v643_v27  ;;  %v446_v16 = vld [vmem:[%s1413_s25 + $0x758] sm:$0xff]  ;;  %v681_v26 = vmul.f32 %v1440_v18, %v439_v1  ;;  %v682_v27 = vmul.f32 %v1440_v18, %v440_v2  ;;  %v685_v30 = vmul.f32 %v1440_v18, %v443_v9 }
 0x137   : > { %880 = vst [vmem:[%s1480_s27 + $0x5f8] sm:$0xff] %v644_v28  ;;  %881 = vst [vmem:[%s1480_s27 + $0x600] sm:$0xff] %v645_v32  ;;  %v683_v28 = vmul.f32 %v1440_v18, %v441_v7  ;;  %v686_v31 = vmul.f32 %v1440_v18, %v444_v14  ;;  %v687_v32 = vmul.f32 %v1440_v18, %v445_v15 }
 0x138   : > { %882 = vst [vmem:[%s1480_s27 + $0x608] sm:$0xff] %v646_v33  ;;  %883 = vst [vmem:[%s1480_s27 + $0x610] sm:$0xff] %v647_v34  ;;  %v688_v33 = vmul.f32 %v1440_v18, %v446_v16 }
 0x139   : > { %884 = vst [vmem:[%s1480_s27 + $0x618] sm:$0xff] %v648_v35  ;;  %885 = vst [vmem:[%s1480_s27 + $0x620] sm:$0xff] %v649_v39 }
 0x13a   : > { %886 = vst [vmem:[%s1480_s27 + $0x628] sm:$0xff] %v650_v40  ;;  %887 = vst [vmem:[%s1480_s27 + $0x630] sm:$0xff] %v651_v41 }
 0x13b   : > { %888 = vst [vmem:[%s1480_s27 + $0x638] sm:$0xff] %v652_v42  ;;  %889 = vst [vmem:[%s1480_s27 + $0x640] sm:$0xff] %v653_v46 }
 0x13c   : > { %890 = vst [vmem:[%s1480_s27 + $0x648] sm:$0xff] %v654_v47  ;;  %891 = vst [vmem:[%s1480_s27 + $0x650] sm:$0xff] %v655_v48 }
 0x13d   : > { %892 = vst [vmem:[%s1480_s27 + $0x658] sm:$0xff] %v656_v49  ;;  %893 = vst [vmem:[%s1480_s27 + $0x660] sm:$0xff] %v657_v53 }
 0x13e   : > { %894 = vst [vmem:[%s1480_s27 + $0x668] sm:$0xff] %v658_v54  ;;  %895 = vst [vmem:[%s1480_s27 + $0x670] sm:$0xff] %v659_v55 }
 0x13f   : > { %896 = vst [vmem:[%s1480_s27 + $0x678] sm:$0xff] %v660_v56  ;;  %897 = vst [vmem:[%s1480_s27 + $0x680] sm:$0xff] %v661_v60 }
 0x140   : > { %898 = vst [vmem:[%s1480_s27 + $0x688] sm:$0xff] %v662_v61  ;;  %899 = vst [vmem:[%s1480_s27 + $0x690] sm:$0xff] %v663_v62 }
 0x141   : > { %900 = vst [vmem:[%s1480_s27 + $0x698] sm:$0xff] %v664_v63  ;;  %901 = vst [vmem:[%s1480_s27 + $0x6a0] sm:$0xff] %v665_v3 }
 0x142   : > { %902 = vst [vmem:[%s1480_s27 + $0x6a8] sm:$0xff] %v666_v4  ;;  %903 = vst [vmem:[%s1480_s27 + $0x6b0] sm:$0xff] %v667_v5 }
 0x143   : > { %904 = vst [vmem:[%s1480_s27 + $0x6b8] sm:$0xff] %v668_v6  ;;  %905 = vst [vmem:[%s1480_s27 + $0x6c0] sm:$0xff] %v669_v10 }
 0x144   : > { %906 = vst [vmem:[%s1480_s27 + $0x6c8] sm:$0xff] %v670_v11  ;;  %907 = vst [vmem:[%s1480_s27 + $0x6d0] sm:$0xff] %v671_v12 }
 0x145   : > { %908 = vst [vmem:[%s1480_s27 + $0x6d8] sm:$0xff] %v672_v13  ;;  %909 = vst [vmem:[%s1480_s27 + $0x6e0] sm:$0xff] %v673_v17 }
 0x146   : > { %910 = vst [vmem:[%s1480_s27 + $0x6e8] sm:$0xff] %v674_v19  ;;  %911 = vst [vmem:[%s1480_s27 + $0x6f0] sm:$0xff] %v675_v20 }
 0x147   : > { %912 = vst [vmem:[%s1480_s27 + $0x6f8] sm:$0xff] %v676_v21  ;;  %913 = vst [vmem:[%s1480_s27 + $0x700] sm:$0xff] %v677_v22  ;;  %932 = sbr.rel (!%p1352_p9) target bundleno = 362 (0x16a), region = 36 }
 0x148   : > { %914 = vst [vmem:[%s1480_s27 + $0x708] sm:$0xff] %v678_v23  ;;  %915 = vst [vmem:[%s1480_s27 + $0x710] sm:$0xff] %v679_v24 }
 0x149   : > { %916 = vst [vmem:[%s1480_s27 + $0x718] sm:$0xff] %v680_v25  ;;  %917 = vst [vmem:[%s1480_s27 + $0x720] sm:$0xff] %v681_v26 }
 0x14a   : > { %918 = vst [vmem:[%s1480_s27 + $0x728] sm:$0xff] %v682_v27  ;;  %919 = vst [vmem:[%s1480_s27 + $0x730] sm:$0xff] %v683_v28 }
 0x14b   : > { %920 = vst [vmem:[%s1480_s27 + $0x738] sm:$0xff] %v684_v29  ;;  %921 = vst [vmem:[%s1480_s27 + $0x740] sm:$0xff] %v685_v30 }
 0x14c   : > { %922 = vst [vmem:[%s1480_s27 + $0x748] sm:$0xff] %v686_v31  ;;  %923 = vst [vmem:[%s1480_s27 + $0x750] sm:$0xff] %v687_v32 }
 0x14d   : > { %924 = vst [vmem:[%s1480_s27 + $0x758] sm:$0xff] %v688_v33 }
 0x14e   : > { %s2739_s4 = smov (!%p935_p8, %s934_s4), 236 }
 0x14f   : > { %s2646_s7 = sshll.u32 %s2739_s4, 7 }
 0x150   : > { %s939_s3 = ssub.s32 30208, %s2646_s7 }
 0x151   : > { %940 = vsyncadd %s926_s5, %s939_s3  ;;  %s1068_s17 = smul.u32 706, %s1256_s13  ;;  %p1059_p1 = scmp.ne.s32.totalorder %s2646_s7, 0 }
 0x152   : > { %s948_s24 = sshll.u32 %s1480_s27, 4  ;;  %s1272_s6 = smov [#allocation5]   ;;  %s2654_s24 = int_to_ptr.vmem [resolvable:$true] %s948_s24 }
 0x153   : > { %s943_s18 = sadd.s32 %s1068_s17, %s933_s30  ;;  %s1170_s25 = scalar_lea.vmem %s2654_s24, %s2646_s7 }
 0x154   : > { %s1060_s12 = sshll.u32 %s943_s18, 7  ;;  %p1171_p9 = scmp.ne.s32.totalorder %s2654_s24, %s1170_s25 }
 0x155   : > { %s945_s22 = scalar_lea.hbm %s2710_s2, %s1060_s12  ;;  %s1174_s13 = sshll.u32 %s1272_s6, 4  ;;  %s1175_s13 = int_to_ptr.vmem [resolvable:$false] %s1174_s13 }
 0x156   : > { %p1172_p13 = pnand %p1171_p9, %p1059_p1  ;;  %s1176_s23 = scalar_lea.vmem %s1175_s13, 60416 }
 0x157   : > { %p1177_p2 = scmp.lt.s32.totalorder %s2654_s24, %s1175_s13  ;;  %p1178_p3 = scmp.lt.s32.totalorder %s1176_s23, %s1170_s25 }
 0x158   : > { %p1173_p0 = pneg %p1172_p13 }
 0x159   : > { %p1179_p5 = por %p1178_p3, %p1177_p2 }
 0x15b   : > { %p1180_p6 = pnand %p1179_p5, %p1173_p0 }
 0x15d   : > { %1183 = shalt.err (!%p1180_p6)
}
 0x15e   : > { %s1184_s8 = scalar_lea.hbm %s945_s22, %s2646_s7  ;;  %s1188_s27 = scalar_lea.hbm %s2710_s2, 180736 }
 0x15f   : > { %p1185_p7 = scmp.ne.s32.totalorder %s945_s22, %s1184_s8  ;;  %p1189_p11 = scmp.lt.u32.totalorder %s945_s22, %s2710_s2 }
 0x160   : > { %p1190_p12 = scmp.lt.u32.totalorder %s1188_s27, %s1184_s8  ;;  %p1192_p9 = scmp.lt.u32.totalorder %s1184_s8, %s945_s22 }
 0x161   : > { %p1186_p4 = pnand %p1185_p7, %p1059_p1 }
 0x162   : > { %p1191_p8 = por %p1190_p12, %p1189_p11 }
 0x163   : > { %p1187_p10 = pneg %p1186_p4 }
 0x164   : > { %p1193_p13 = por %p1192_p9, %p1191_p8 }
 0x166   : > { %p1194_p0 = pnand %p1193_p13, %p1187_p10 }
 0x168   : > { %1197 = shalt.err (!%p1194_p0)
}
 0x169   : > { %951 = dma.vmem_to_hbm [thread:$0]  (%p1059_p1), %s2654_s24, %s2646_s7, %s945_s22, %s926_s5  }
 0x16a PF: > { %p1075_p2 = scmp.ge.s32.totalorder %s1268_s16, 2  ;;  %s960_s3 = sand.u32 1, %s1240_s9  }
 0x16b   : > { %p2721_p3 = scmp.ne.s32.totalorder %s2720_s28, 0  ;;  %s961_s17 = scalar_lea.sflag [#allocation4], %s960_s3 }
 0x16d   : > { %p1072_p5 = pnand %p1075_p2, %p2721_p3 }
 0x16f   : > { %1235 = dma.done.wait (!%p1072_p5), %s961_s17, 30208  }
 0x170   : > { %1237 = vsyncadd (!%p1072_p5), %s961_s17, 4294937088  ;;  %s18_s16 = sadd.s32 1, %s1268_s16   ;;  %s2722_s13 = sld [smem:[#allocation8_spill]] }
 0x171   : > { %p15_p6 = scmp.ge.s32.totalorder %s18_s16, 8   ;;  %s2723_s19 = sld [smem:[#allocation9_spill]] }
 0x172   : > { %s2724_s15 = sld [smem:[#allocation10_spill]]  ;;  %s2725_s9 = smov %s1244_s10 }
 0x173   : > { %s2726_s10 = smov %s1248_s11  ;;  %s2727_s11 = smov %s1364_s29 }
 0x174   : > { %s2728_s12 = smov %s1260_s14  ;;  %17 = sbr.rel (!%p15_p6) target bundleno = 7 (0x7), region = 76 }
 0x177   : > { %s2729_s14 = smov %s2723_s19 }
 0x17b   :  { %966 = vsyncpa [#allocation3], 1 }
 0x17c   :  { %968 = vsyncpa [#allocation3 + $0x1], 1 }
 0x17d   :  { %969 = vsyncpa [#allocation4], 1 }
 0x17e   :  { %971 = vsyncpa [#allocation4 + $0x1], 1 }

</bundles_post_ra>
